<compile_context>
chip_gen: v5e
topology: v5e:2x2
jax: 0.10.0
libtpu: 0.0.40
codegen_flags: <defaults>
</compile_context>

<pallas_src>
import numpy as np
import jax
import jax.numpy as jnp
from jax import lax
from jax.experimental import pallas as pl
from jax.experimental.pallas import tpu as pltpu

# Kinematic tree (same as the PyTorch module).
KINEMATIC_PARENTS = [0, 0, 1, 1, 2, 3, 4, 5, 2, 3, 8, 9, 10, 11, 12, 13]
NUM_JOINTS = len(KINEMATIC_PARENTS)      # 16
NUM_COORDS = 3
ROW = NUM_JOINTS * NUM_COORDS            # 48 = (joint, xyz) flattened
EPS = 1e-8                               # torch CosineSimilarity default eps

# Default batch tile (rows per grid step).  ~1.5 MB of f32 input per step.
DEFAULT_BATCH_TILE = 4096


def _bone_matrices():
    """Constant matrices: D (48,48) child-minus-parent, S (48,16) 3-coord sum."""
    d = np.zeros((ROW, ROW), np.float32)
    for j, p in enumerate(KINEMATIC_PARENTS):
        for c in range(NUM_COORDS):
            d[NUM_COORDS * j + c, NUM_COORDS * j + c] += 1.0
            d[NUM_COORDS * p + c, NUM_COORDS * j + c] -= 1.0
    # Joint 0 is its own parent -> its D column is exactly zero, so "bone 0"
    # contributes w12 = w1 = w2 = 0 and therefore cos = 0 (eps clamp), which
    # reproduces the [:, 1:, :] slice of the PyTorch module for free.
    s = np.zeros((ROW, NUM_JOINTS), np.float32)
    for j in range(NUM_JOINTS):
        for c in range(NUM_COORDS):
            s[NUM_COORDS * j + c, j] = 1.0
    return jnp.asarray(d), jnp.asarray(s)


def _make_kernel(batch_size):
    """Kernel closure: batch_size is static (trace-time) for tail masking."""

    def kernel(x_ref, y_ref, d_ref, s_ref, out_ref):
        tb = x_ref.shape[0]                       # static block size
        f32 = jnp.float32

        x = x_ref[...].astype(f32)                # (tb, 48)
        y = y_ref[...].astype(f32)
        d = d_ref[...]                            # (48, 48)
        s = s_ref[...]                            # (48, 16)

        # Bone vectors via constant MXU matmul (row-independent gather).
        xb = jnp.dot(x, d, preferred_element_type=f32)          # (tb, 48)
        yb = jnp.dot(y, d, preferred_element_type=f32)          # (tb, 48)

        # Per-bone 3-term reductions, also on the MXU.
        w12 = jnp.dot(xb * yb, s, preferred_element_type=f32)   # (tb, 16)
        w1 = jnp.dot(xb * xb, s, preferred_element_type=f32)    # (tb, 16)
        w2 = jnp.dot(yb * yb, s, preferred_element_type=f32)    # (tb, 16)

        # torch: w12 / sqrt(clamp_min(w1*w2, eps^2)); rsqrt rides the EUP slot.
        cos = w12 * lax.rsqrt(jnp.maximum(w1 * w2, EPS * EPS))  # (tb, 16)

        if batch_size % tb != 0:
            # Ragged last grid block: mask rows past the true batch (no
            # wrapper-side jnp.pad / extra HBM pass).  Static Python branch.
            row = pl.program_id(0) * tb + lax.broadcasted_iota(
                jnp.int32, (tb, 1), 0)
            cos = jnp.where(row < batch_size, cos, 0.0)

        partial = jnp.sum(cos)                    # scalar partial sum per block
        out_ref[...] = jnp.zeros(out_ref.shape, out_ref.dtype) + partial

    return kernel


def loss_func_cos_sim(pose_predicted, pose_gt, *, batch_tile=DEFAULT_BATCH_TILE):
    """Pallas equivalent of LossFuncCosSim.forward.  Inputs: (B, 16, 3)."""
    B, J, C = pose_predicted.shape
    assert (J, C) == (NUM_JOINTS, NUM_COORDS)
    assert pose_gt.shape == pose_predicted.shape

    # Free, contiguous reshape; keep the incoming dtype (bf16 stays bf16 on DMA).
    x = pose_predicted.reshape(B, ROW)
    y = pose_gt.reshape(B, ROW)
    d_mat, s_mat = _bone_matrices()

    if B <= 8:
        tb = B                        # single block == full array dims (legal)
    else:
        # >= 2 grid steps so both v7x TensorCores get work; cap by batch_tile.
        half = (((B + 1) // 2) + 7) // 8 * 8      # ceil(B/2) rounded up to 8
        tb = min(batch_tile, half)
    nb = (B + tb - 1) // tb

    out = pl.pallas_call(
        _make_kernel(B),
        out_shape=jax.ShapeDtypeStruct((nb * 8, 128), jnp.float32),
        grid=(nb,),
        in_specs=[
            pl.BlockSpec((tb, ROW), lambda i: (i, 0)),
            pl.BlockSpec((tb, ROW), lambda i: (i, 0)),
            pl.BlockSpec((ROW, ROW), lambda i: (0, 0)),          # D (fetched once)
            pl.BlockSpec((ROW, NUM_JOINTS), lambda i: (0, 0)),   # S (fetched once)
        ],
        out_specs=pl.BlockSpec((8, 128), lambda i: (i, 0)),
        compiler_params=pltpu.CompilerParams(
            dimension_semantics=("parallel",),    # independent batch blocks
        ),
    )(x, y, d_mat, s_mat)

    partials = out[::8, 0]                        # one scalar per grid step
    # Mean over the *true* batch of the per-sample bone-cosine sums.
    return jnp.sum(partials) / B


def _reference_loss(pose_predicted, pose_gt):
    """Pure-JAX reference mirroring the PyTorch forward, for validation."""
    parents = jnp.array(KINEMATIC_PARENTS, dtype=jnp.int32)
    pb = (pose_predicted - pose_predicted[:, parents, :])[:, 1:, :]
    gb = (pose_gt - pose_gt[:, parents, :])[:, 1:, :]
    w12 = jnp.sum(pb * gb, axis=2)
    w1 = jnp.sum(pb * pb, axis=2)
    w2 = jnp.sum(gb * gb, axis=2)
    cos = w12 / jnp.sqrt(jnp.maximum(w1 * w2, EPS * EPS))
    return jnp.mean(jnp.sum(cos, axis=1), axis=0)


if __name__ == "__main__":
    key = jax.random.PRNGKey(0)
    k1, k2, k3, k4 = jax.random.split(key, 4)

    # Primary small test (single block, block == full array dims).
    B = 2
    pose_predicted = jax.random.normal(k1, (B, NUM_JOINTS, NUM_COORDS), dtype=jnp.float32)
    pose_gt = jax.random.normal(k2, (B, NUM_JOINTS, NUM_COORDS), dtype=jnp.float32)

    loss = jax.block_until_ready(loss_func_cos_sim(pose_predicted, pose_gt))
    ref = jax.block_until_ready(_reference_loss(pose_predicted, pose_gt))
    assert jnp.allclose(loss, ref, atol=1e-4, rtol=1e-4), (loss, ref)

    # Secondary test: multi-step grid, ragged-tail masking, bf16 ingest.
    B2 = 300
    pp2 = jax.random.normal(k3, (B2, NUM_JOINTS, NUM_COORDS), jnp.float32).astype(jnp.bfloat16)
    pg2 = jax.random.normal(k4, (B2, NUM_JOINTS, NUM_COORDS), jnp.float32).astype(jnp.bfloat16)
    loss2 = jax.block_until_ready(loss_func_cos_sim(pp2, pg2))
    ref2 = jax.block_until_ready(
        _reference_loss(pp2.astype(jnp.float32), pg2.astype(jnp.float32)))
    assert jnp.allclose(loss2, ref2, atol=1e-3, rtol=1e-3), (loss2, ref2)

    print("KERNEL_OK")
</pallas_src>

<mosaic_0001>
module attributes {stable_mosaic.version = 11 : i64} {
  func.func @kernel(%arg0: i32, %arg1: memref<2x48xf32, #tpu.memory_space<vmem>>, %arg2: memref<2x48xf32, #tpu.memory_space<vmem>>, %arg3: memref<48x48xf32, #tpu.memory_space<vmem>>, %arg4: memref<48x16xf32, #tpu.memory_space<vmem>>, %arg5: memref<8x128xf32, #tpu.memory_space<vmem>>) attributes {dimension_semantics = [#tpu.dimension_semantics<parallel>], iteration_bounds = array<i64: 1>, scalar_prefetch = 0 : i64, scratch_operands = 0 : i64, tpu.core_type = #tpu.core_type<tc>, window_params = [{transform_indices = @transform_0, window_bounds = array<i64: 2, 48>}, {transform_indices = @transform_1, window_bounds = array<i64: 2, 48>}, {pipeline_mode = #tpu.pipeline_mode<synchronous>, transform_indices = @transform_2, window_bounds = array<i64: 48, 48>}, {pipeline_mode = #tpu.pipeline_mode<synchronous>, transform_indices = @transform_3, window_bounds = array<i64: 48, 16>}, {transform_indices = @transform_4, window_bounds = array<i64: 8, 128>}]} {
    %c0 = arith.constant 0 : index
    %c0_0 = arith.constant 0 : index
    %0 = vector.load %arg1[%c0, %c0_0] : memref<2x48xf32, #tpu.memory_space<vmem>>, vector<2x48xf32>
    %c0_1 = arith.constant 0 : index
    %c0_2 = arith.constant 0 : index
    %1 = vector.load %arg2[%c0_1, %c0_2] : memref<2x48xf32, #tpu.memory_space<vmem>>, vector<2x48xf32>
    %c0_3 = arith.constant 0 : index
    %c0_4 = arith.constant 0 : index
    %2 = vector.load %arg3[%c0_3, %c0_4] : memref<48x48xf32, #tpu.memory_space<vmem>>, vector<48x48xf32>
    %c0_5 = arith.constant 0 : index
    %c0_6 = arith.constant 0 : index
    %3 = vector.load %arg4[%c0_5, %c0_6] : memref<48x16xf32, #tpu.memory_space<vmem>>, vector<48x16xf32>
    %cst = arith.constant dense<0.000000e+00> : vector<2x48xf32>
    %4 = tpu.matmul %0, %2, %cst {dimension_numbers = #tpu.dot_dimension_numbers<[1], [0], [0], [1], [0, 0, 1, 1], [], []>} : vector<2x48xf32>, vector<48x48xf32>, vector<2x48xf32> -> vector<2x48xf32>
    %cst_7 = arith.constant dense<0.000000e+00> : vector<2x48xf32>
    %5 = tpu.matmul %1, %2, %cst_7 {dimension_numbers = #tpu.dot_dimension_numbers<[1], [0], [0], [1], [0, 0, 1, 1], [], []>} : vector<2x48xf32>, vector<48x48xf32>, vector<2x48xf32> -> vector<2x48xf32>
    %6 = arith.mulf %4, %5 : vector<2x48xf32>
    %cst_8 = arith.constant dense<0.000000e+00> : vector<2x16xf32>
    %7 = tpu.matmul %6, %3, %cst_8 {dimension_numbers = #tpu.dot_dimension_numbers<[1], [0], [0], [1], [0, 0, 1, 1], [], []>} : vector<2x48xf32>, vector<48x16xf32>, vector<2x16xf32> -> vector<2x16xf32>
    %8 = arith.mulf %4, %4 : vector<2x48xf32>
    %cst_9 = arith.constant dense<0.000000e+00> : vector<2x16xf32>
    %9 = tpu.matmul %8, %3, %cst_9 {dimension_numbers = #tpu.dot_dimension_numbers<[1], [0], [0], [1], [0, 0, 1, 1], [], []>} : vector<2x48xf32>, vector<48x16xf32>, vector<2x16xf32> -> vector<2x16xf32>
    %10 = arith.mulf %5, %5 : vector<2x48xf32>
    %cst_10 = arith.constant dense<0.000000e+00> : vector<2x16xf32>
    %11 = tpu.matmul %10, %3, %cst_10 {dimension_numbers = #tpu.dot_dimension_numbers<[1], [0], [0], [1], [0, 0, 1, 1], [], []>} : vector<2x48xf32>, vector<48x16xf32>, vector<2x16xf32> -> vector<2x16xf32>
    %12 = arith.mulf %9, %11 : vector<2x16xf32>
    %cst_11 = arith.constant 1.000000e-16 : f32
    %13 = vector.broadcast %cst_11 : f32 to vector<2x16xf32>
    %14 = arith.maximumf %12, %13 : vector<2x16xf32>
    %15 = math.rsqrt %14 : vector<2x16xf32>
    %16 = arith.mulf %7, %15 : vector<2x16xf32>
    %17 = vector.shape_cast %16 : vector<2x16xf32> to vector<1x2x16xf32>
    %cst_12 = arith.constant dense<0.000000e+00> : vector<1xf32>
    %18 = vector.multi_reduction <add>, %17, %cst_12 [1, 2] : vector<1x2x16xf32> to vector<1xf32>
    %19 = vector.shape_cast %18 : vector<1xf32> to vector<1x1x1xf32>
    %20 = vector.extract %19[0, 0, 0] : f32 from vector<1x1x1xf32>
    %cst_13 = arith.constant 0.000000e+00 : f32
    %21 = vector.broadcast %cst_13 : f32 to vector<8x128xf32>
    %22 = vector.broadcast %20 : f32 to vector<8x128xf32>
    %23 = arith.addf %21, %22 : vector<8x128xf32>
    %c0_14 = arith.constant 0 : index
    %c0_15 = arith.constant 0 : index
    %24 = vector.load %arg5[%c0_14, %c0_15] : memref<8x128xf32, #tpu.memory_space<vmem>>, vector<8x128xf32>
    tpu.vector_store %arg5[%c0_14, %c0_15], %23 {strides = array<i32>} : memref<8x128xf32, #tpu.memory_space<vmem>>, vector<8x128xf32>,
    return
  }
  func.func @transform_0(%arg0: i32) -> (i32, i32) {
    %c0_i32 = arith.constant 0 : i32
    %c0_i32_0 = arith.constant 0 : i32
    return %arg0, %c0_i32 : i32, i32
  }
  func.func @transform_1(%arg0: i32) -> (i32, i32) {
    %c0_i32 = arith.constant 0 : i32
    %c0_i32_0 = arith.constant 0 : i32
    return %arg0, %c0_i32 : i32, i32
  }
  func.func @transform_2(%arg0: i32) -> (i32, i32) {
    %c0_i32 = arith.constant 0 : i32
    %c0_i32_0 = arith.constant 0 : i32
    %c0_i32_1 = arith.constant 0 : i32
    return %c0_i32, %c0_i32_0 : i32, i32
  }
  func.func @transform_3(%arg0: i32) -> (i32, i32) {
    %c0_i32 = arith.constant 0 : i32
    %c0_i32_0 = arith.constant 0 : i32
    %c0_i32_1 = arith.constant 0 : i32
    return %c0_i32, %c0_i32_0 : i32, i32
  }
  func.func @transform_4(%arg0: i32) -> (i32, i32) {
    %c0_i32 = arith.constant 0 : i32
    %c0_i32_0 = arith.constant 0 : i32
    return %arg0, %c0_i32 : i32, i32
  }
}

</mosaic_0001>

<bundles_post_ra>
// kernel: tpu_custom_call.1
= control target key start
LH: loop header
LB: loop body
LE: loop exit
PB: predicated region body
PF: predicated region fallthrough
CT: control target
= control target key end

     0   :  { %s306_s0 = inlined_call_operand.vmem [shape: f32[2,48], index: 0, kind: input, shape index: {}]   ;;  %s307_s1 = inlined_call_operand.vmem [shape: f32[2,48], index: 1, kind: input, shape index: {}]   ;;  %s308_s2 = inlined_call_operand.vmem [shape: f32[48,48], index: 2, kind: input, shape index: {}]   ;;  %s309_s3 = inlined_call_operand.vmem [shape: f32[48,16], index: 3, kind: input, shape index: {}]   ;;  %s310_s4 = inlined_call_operand.hbm [shape: f32[8,128], index: 4, kind: output, shape index: {}]  }
   0x1   :  { %v25_v0 = vld [vmem:[%s308_s2 + $0x28] sm:$0xff]  ;;  %v24_v1 = vld [vmem:[%s308_s2 + $0x20] sm:$0xff]  ;;  %v23_v2 = vld [vmem:[%s308_s2 + $0x18] sm:$0xff] }
   0x2   :  { %46 = vmatpush.msra.mxu0 %v25_v0  ;;  %69 = vmatpush.msra.mxu1 %v25_v0  ;;  %v31_v3 = vld [vmem:[%s309_s3 + $0x28] sm:$0xff]  ;;  %v30_v4 = vld [vmem:[%s309_s3 + $0x20] sm:$0xff]  ;;  %v22_v5 = vld [vmem:[%s308_s2 + $0x10] sm:$0xff] }
   0x3   :  { %93 = vmatpush.msra.mxu2 %v31_v3  ;;  %117 = vmatpush.msra.mxu3 %v31_v3 }
   0x4   :  { %47 = vmatpush.msra.mxu0 %v24_v1  ;;  %70 = vmatpush.msra.mxu1 %v24_v1 }
   0x5   :  { %9 = vsyncpa [#allocation3], 0  ;;  %v29_v6 = vld [vmem:[%s309_s3 + $0x18] sm:$0xff]  ;;  %v21_v7 = vld [vmem:[%s308_s2 + $0x8] sm:$0xff]  ;;  %94 = vmatpush.msra.mxu2 %v30_v4  ;;  %118 = vmatpush.msra.mxu3 %v30_v4  ;;  %vm32_vm0 = vcmask 392192   ;;  %vm164_vm4 = vcmask 123904  }
   0x6   :  { %48 = vmatpush.msra.mxu0 %v23_v2  ;;  %71 = vmatpush.msra.mxu1 %v23_v2  ;;  %v28_v8 = vld [vmem:[%s309_s3 + $0x10] sm:$0xff]  ;;  %v20_v9 = vld [vmem:[%s308_s2] sm:$0xff]  ;;  %v27_v12 = vld [vmem:[%s309_s3 + $0x8] sm:$0xff]  ;;  %s185_s17 = sshll.u32 %s310_s4, 4  ;;  %s186_s17 = int_to_ptr.hbm [resolvable:$true] %s185_s17 }
   0x7   :  { %95 = vmatpush.msra.mxu2 %v29_v6  ;;  %119 = vmatpush.msra.mxu3 %v29_v6  ;;  %v18_v10 = vld [vmem:[%s306_s0] sm:$0x3] }
   0x8   :  { %49 = vmatpush.msra.mxu0 %v22_v5  ;;  %72 = vmatpush.msra.mxu1 %v22_v5  ;;  %v19_v11 = vld [vmem:[%s307_s1] sm:$0x3] }
   0x9   :  { %96 = vmatpush.msra.mxu2 %v28_v8  ;;  %120 = vmatpush.msra.mxu3 %v28_v8  ;;  %v26_v13 = vld [vmem:[%s309_s3] sm:$0xff]  ;;  %s230_s3 = smov [#allocation2]  }
   0xa   :  { %50 = vmatpush.msra.mxu0 %v21_v7  ;;  %73 = vmatpush.msra.mxu1 %v21_v7  ;;  %s183_s14 = sshll.u32 %s230_s3, 4  ;;  %s184_s14 = int_to_ptr.vmem [resolvable:$true] %s183_s14 }
   0xb   :  { %97 = vmatpush.msra.mxu2 %v27_v12  ;;  %121 = vmatpush.msra.mxu3 %v27_v12 }
   0xc   :  { %51 = vmatpush.msra.mxu0 %v20_v9  ;;  %74 = vmatpush.msra.mxu1 %v20_v9 }
   0xd   :  { %194 = vmatmul.msk.f32.vlgmr.msra.gmra.mxu0 %vm32_vm0, %v18_v10  ;;  %195 = vmatmul.msk.f32.vlgmr.msra.gmra.mxu1 %vm32_vm0, %v19_v11 }
   0xe   :  { %141 = vmatpush.msrb.mxu0 %v31_v3  ;;  %98 = vmatpush.msra.mxu2 %v26_v13 }
   0xf   :  { %122 = vmatpush.msra.mxu3 %v26_v13 }
  0x10   :  { %142 = vmatpush.msrb.mxu0 %v30_v4 }
  0x12   :  { %143 = vmatpush.msrb.mxu0 %v29_v6 }
  0x14   :  { %144 = vmatpush.msrb.mxu0 %v28_v8 }
  0x16   :  { %145 = vmatpush.msrb.mxu0 %v27_v12 }
  0x18   :  { %146 = vmatpush.msrb.mxu0 %v26_v13 }
  0x8a   :  { %v53_v14 = vpop.f32.mrf.mxu0  ;;  %v76_v15 = vpop.f32.mrf.mxu1 }
  0x8b   :  { %v103_v16 = vmul.f32 %v53_v14, %v53_v14  ;;  %v79_v17 = vmul.f32 %v76_v15, %v53_v14  ;;  %v127_v18 = vmul.f32 %v76_v15, %v76_v15 }
  0x8d   :  { %196 = vmatmul.msk.f32.vlgmr.msra.gmra.mxu2 %vm32_vm0, %v79_v17  ;;  %197 = vmatmul.msk.f32.vlgmr.msra.gmra.mxu3 %vm32_vm0, %v103_v16 }
  0x8e   :  { %198 = vmatmul.msk.f32.vlgmr.msrb.gmra.mxu0 %vm32_vm0, %v127_v18 }
 0x10b   :  { %v148_v19 = vpop.f32.mrf.mxu0 }
 0x110   :  { %v124_v20 = vpop.f32.mrf.mxu3  ;;  %v100_v29 = vpop.f32.mrf.mxu2 }
 0x111   :  { %v151_v21 = vmul.f32 %v148_v19, %v124_v20 }
 0x113   :  { %v152_v22 = vmax.f32 %v151_v21, 1e-16 }
 0x115   :  { %202 = vrsqrt.f32 %v152_v22  ;;  %vm159_vm2 = vweird.f32 %v152_v22 }
 0x11b   :  { %v203_v23 = vpop.eup %202 }
 0x11c   :  { %v154_v24 = vmul.f32 %v203_v23, %v152_v22  ;;  %vm160_vm1 = vweird.f32 %v203_v23 }
 0x11d   :  { %vm161_vm3 = vmor %vm159_vm2, %vm160_vm1 }
 0x11e   :  { %v155_v25 = vmul.f32 %v203_v23, %v154_v24 }
 0x120   :  { %v156_v26 = vmul.f32 0.5, %v155_v25 }
 0x122   :  { %v157_v27 = vsub.f32 1.5, %v156_v26 }
 0x124   :  { %v158_v28 = vmul.f32 %v203_v23, %v157_v27 }
 0x126   :  { %v162_v30 = vsel %vm161_vm3, %v203_v23, %v158_v28 }
 0x127   :  { %v163_v31 = vmul.f32 %v162_v30, %v100_v29 }
 0x129   :  { %v165_v32 = vsel %vm164_vm4, %v163_v31, 0.0 }
 0x12a   :  { %166 = vadd.xlane.f32.xlu0 %v165_v32 }
 0x19d   :  { %v167_v33 = vpop.xlane.xlu0 %166 }
 0x19e   :  { %v168_v34 = vrot.slane %v167_v33, 4 }
 0x1a0   :  { %v169_v35 = vadd.f32 %v168_v34, %v167_v33 }
 0x1a2   :  { %v170_v36 = vrot.slane %v169_v35, 2 }
 0x1a4   :  { %v171_v37 = vadd.f32 %v170_v36, %v169_v35 }
 0x1a6   :  { %v172_v38 = vrot.slane %v171_v37, 1 }
 0x1a8   :  { %v173_v39 = vadd.f32 %v172_v38, %v171_v37 }
 0x1aa   :  { %199 = vpush %v173_v39 }
 0x1db   :  { %s200_s18 = spop %199 }
 0x1dc   :  { %v175_v40 = vstv %s200_s18 }
 0x1dd   :  { %177 = vst [vmem:[#allocation2] sm:$0xff] %v175_v40 }
 0x1de   :  { %188 = dma.vmem_to_hbm [thread:$0]  %s184_s14, 128, %s186_s17, [#allocation3]  }
 0x1df   :  { %228 = dma.done.wait [#allocation3], 128  }
 0x1e0   :  { %229 = vsyncadd [#allocation3], 4294967168 }
 0x1e1   :  { %193 = vsyncpa [#allocation3], 1 }

</bundles_post_ra>
